<compile_context>
chip_gen: v5e
topology: v5e:2x2
jax: 0.10.0
libtpu: 0.0.40
codegen_flags: <defaults>
</compile_context>

<pallas_src>
import jax
import jax.numpy as jnp
from jax.experimental import pallas as pl
from jax.experimental.pallas import tpu as pltpu


_TARGET_BLOCK_BYTES = 1 << 20      # ~1 MiB input block per grid step
_MIN_VMEM = 8 << 20
_MAX_VMEM = 48 << 20               # safe on v5e/v6e (128 MiB) and v7x (64 MiB)


def _ceil_to(v, m):
    return -(-v // m) * m


def _clamp_vmem(v):
    return int(min(max(v, _MIN_VMEM), _MAX_VMEM))


def _pick_batch_block(n, bytes_per_sample, cap, target):
    """Largest divisor of n that is <= cap and keeps the block near the target size."""
    nb = max(1, min(n, cap, target // max(int(bytes_per_sample), 1)))
    while n % nb:
        nb -= 1
    return nb


def _pick_h_tile(h, row_bytes, budget):
    """Largest multiple of 8 that divides h and keeps one H tile under `budget`.

    Returns h itself when no tiling is needed or no clean tile exists (th == h is
    always legal: a full-extent block dim is exempt from the (8,128) rule).
    """
    if h * row_bytes <= budget:
        return h
    max_th = max(8, (budget // max(int(row_bytes), 1)) // 8 * 8)
    for cand in range(min(max_th, (h // 8) * 8), 7, -8):
        if h % cand == 0:
            return cand
    # TODO(synk): an H with no multiple-of-8 divisor (e.g. prime H on a huge map)
    # falls back to a single whole-H block, which may pressure VMEM.
    return h


# ----------------------------------------------------------------------------
# Kernels
# ----------------------------------------------------------------------------

def _make_gate_kernel(inv_hw):
    """Reduce pass: gate = sigmoid(Conv1x1(mean(cat(max_h, max_v)))).

    Grid is (batch_blocks, h_tiles) with the H axis innermost ("arbitrary").
    Partial row-max sums / column maxes live in VMEM scratch; the gate is
    computed and stored on the last H tile (standard accumulator pattern).
    """
    def kernel(x_ref, w_ref, b_ref, g_ref, sum_ref, cmax_ref):
        # x_ref: (nb, C, th, W) input dtype; w_ref: (C, C); b_ref: (C, 1)
        # g_ref: (nb, C, 1) f32; sum_ref: (nb, C, 1) f32; cmax_ref: (nb, C, W) f32
        h = pl.program_id(1)
        nb = x_ref.shape[0]

        @pl.when(h == 0)
        def _():
            sum_ref[...] = jnp.zeros_like(sum_ref)
            cmax_ref[...] = jnp.full_like(cmax_ref, -jnp.inf)

        for i in range(nb):                                     # static unroll, nb <= 8
            xi = x_ref[i]                                       # (C, th, W), input dtype
            # max is exact in the input dtype; only the reduced results go to f32.
            row_max = jnp.max(xi, axis=2).astype(jnp.float32)   # (C, th)  max over W
            col_max = jnp.max(xi, axis=1).astype(jnp.float32)   # (C, W)   max over H tile
            sum_ref[i] = sum_ref[i] + jnp.sum(row_max, axis=1, keepdims=True)
            cmax_ref[i] = jnp.maximum(cmax_ref[i], col_max)

        @pl.when(h == pl.num_programs(1) - 1)
        def _():
            w_f32 = w_ref[...].astype(jnp.float32)              # hoisted out of sample loop
            b_f32 = b_ref[...].astype(jnp.float32)
            for i in range(nb):
                # mean over the concatenated (H+W) axis == (sum_h + sum_v) / (H+W)
                pooled = (sum_ref[i]
                          + jnp.sum(cmax_ref[i], axis=1, keepdims=True)) * inv_hw  # (C, 1)
                # 1x1 conv on a (C,1,1) tensor == (C,C) @ (C,1) + b.  The (C,1)
                # sublane layout is kept on purpose: it later broadcasts over the
                # H*W lanes with no relayout, and this matmul is negligible.
                se = jnp.dot(w_f32, pooled, preferred_element_type=jnp.float32) + b_f32
                g_ref[i] = jax.nn.sigmoid(se)                   # (C, 1) f32
    return kernel


def _scale_kernel(x_ref, g_ref, o_ref):
    # x_ref/o_ref: (nb, C, THW) lane-dense; g_ref: (nb, C, 1) f32
    gate = g_ref[...].astype(x_ref.dtype)           # cast once; multiply in input dtype
    o_ref[...] = x_ref[...] * gate                  # lane-broadcast over H*W


def _fused_kernel(x_ref, w_ref, b_ref, o_ref):
    # Single-pass path (W % 128 == 0 and sample fits VMEM: layout already lane dense).
    nb, _, H, W = x_ref.shape
    w_f32 = w_ref[...].astype(jnp.float32)
    b_f32 = b_ref[...].astype(jnp.float32)
    inv_hw = 1.0 / float(H + W)
    for i in range(nb):
        xi = x_ref[i]                                              # (C, H, W)
        max_h = jnp.max(xi, axis=2).astype(jnp.float32)            # (C, H)
        max_v = jnp.max(xi, axis=1).astype(jnp.float32)            # (C, W)
        pooled = (jnp.sum(max_h, axis=1, keepdims=True)
                  + jnp.sum(max_v, axis=1, keepdims=True)) * inv_hw
        se = jnp.dot(w_f32, pooled, preferred_element_type=jnp.float32) + b_f32
        gate = jax.nn.sigmoid(se).astype(xi.dtype)                 # (C, 1)
        o_ref[i] = xi * gate[:, :, None]                           # (C, H, W)


# ----------------------------------------------------------------------------
# Wrappers
# ----------------------------------------------------------------------------

def _crack_am_gate(x, w, b2, block_bytes):
    """Pass 1: per-sample sigmoid gate, shape (N, C, 1) float32."""
    N, C, H, W = x.shape
    itemsize = x.dtype.itemsize
    w_itemsize = w.dtype.itemsize
    wp = _ceil_to(W, 128)
    cp = _ceil_to(C, 8)
    sample_bytes = C * _ceil_to(H, 8) * wp * itemsize
    nb = _pick_batch_block(N, sample_bytes, cap=8, target=block_bytes)
    row_bytes = nb * C * wp * itemsize                          # one padded H row / block
    th = _pick_h_tile(H, row_bytes, budget=max(block_bytes, 8 * row_bytes))
    x_blk = nb * C * _ceil_to(th, 8) * wp * itemsize
    w_blk = cp * _ceil_to(C, 128) * w_itemsize
    b_blk = cp * 128 * w_itemsize
    g_blk = nb * cp * 128 * 4
    scr_blk = nb * cp * (128 + wp) * 4
    vmem = _clamp_vmem(2 * (x_blk + w_blk + b_blk + g_blk) + scr_blk + (2 << 20))
    cost = pl.CostEstimate(
        flops=int(N * (3 * C * H * W + 2 * C * C)),
        transcendentals=int(N * C),
        bytes_accessed=int(N * C * H * W * itemsize + C * C * w_itemsize + N * C * 4),
    )
    return pl.pallas_call(
        _make_gate_kernel(1.0 / float(H + W)),
        out_shape=jax.ShapeDtypeStruct((N, C, 1), jnp.float32),
        grid_spec=pltpu.PrefetchScalarGridSpec(
            num_scalar_prefetch=0,
            grid=(N // nb, H // th),
            in_specs=[
                pl.BlockSpec((nb, C, th, W), lambda n, h: (n, 0, h, 0)),
                # Constant index_map -> Pallas skips the redundant weight/bias DMAs
                # after the first grid step.
                pl.BlockSpec((C, C), lambda n, h: (0, 0)),
                pl.BlockSpec((C, 1), lambda n, h: (0, 0)),
            ],
            out_specs=pl.BlockSpec((nb, C, 1), lambda n, h: (n, 0, 0)),
            scratch_shapes=[pltpu.VMEM((nb, C, 1), jnp.float32),
                            pltpu.VMEM((nb, C, W), jnp.float32)],
        ),
        compiler_params=pltpu.CompilerParams(
            dimension_semantics=("parallel", "arbitrary"),
            vmem_limit_bytes=vmem),
        cost_estimate=cost,
    )(x, w, b2)


def _crack_am_scale(x_flat, gate, block_bytes):
    """Pass 2: out = x * gate on the lane-dense (N, C, H*W) view."""
    N, C, HW = x_flat.shape
    itemsize = x_flat.dtype.itemsize
    cp = _ceil_to(C, 8)
    sample_bytes = cp * _ceil_to(HW, 128) * itemsize
    nb = _pick_batch_block(N, sample_bytes, cap=N, target=block_bytes)
    # If one sample is still much larger than the target block, tile H*W in
    # multiples of 128 (keeps stores unmasked, bounds VMEM); also gives v7x's
    # second core work when N is tiny.
    thw = HW
    if nb == 1 and HW % 256 == 0:
        while thw % 256 == 0 and cp * thw * itemsize > 2 * block_bytes:
            thw //= 2
    x_blk = nb * cp * _ceil_to(thw, 128) * itemsize
    g_blk = nb * cp * 128 * 4
    vmem = _clamp_vmem(2 * (2 * x_blk + g_blk) + (2 << 20))
    cost = pl.CostEstimate(
        flops=int(N * C * HW),
        transcendentals=0,
        bytes_accessed=int(2 * N * C * HW * itemsize + N * C * 4),
    )
    return pl.pallas_call(
        _scale_kernel,
        out_shape=jax.ShapeDtypeStruct((N, C, HW), x_flat.dtype),
        grid_spec=pltpu.PrefetchScalarGridSpec(
            num_scalar_prefetch=0,
            grid=(N // nb, HW // thw),
            in_specs=[
                pl.BlockSpec((nb, C, thw), lambda n, t: (n, 0, t)),
                pl.BlockSpec((nb, C, 1), lambda n, t: (n, 0, 0)),
            ],
            out_specs=pl.BlockSpec((nb, C, thw), lambda n, t: (n, 0, t)),
        ),
        compiler_params=pltpu.CompilerParams(
            dimension_semantics=("parallel", "parallel"),
            vmem_limit_bytes=vmem),
        cost_estimate=cost,
    )(x_flat, gate)


def _crack_am_fused(x, w, b2, block_bytes):
    """Single-pass path when NCHW is already lane dense (W % 128 == 0) and small."""
    N, C, H, W = x.shape
    itemsize = x.dtype.itemsize
    w_itemsize = w.dtype.itemsize
    sample_bytes = C * _ceil_to(H, 8) * W * itemsize
    nb = _pick_batch_block(N, sample_bytes, cap=8, target=block_bytes)
    x_blk = nb * sample_bytes
    w_blk = _ceil_to(C, 8) * _ceil_to(C, 128) * w_itemsize
    vmem = _clamp_vmem(2 * (2 * x_blk + w_blk) + (2 << 20))
    cost = pl.CostEstimate(
        flops=int(N * (4 * C * H * W + 2 * C * C)),
        transcendentals=int(N * C),
        bytes_accessed=int(2 * N * C * H * W * itemsize + C * C * w_itemsize),
    )
    return pl.pallas_call(
        _fused_kernel,
        out_shape=jax.ShapeDtypeStruct((N, C, H, W), x.dtype),
        grid_spec=pltpu.PrefetchScalarGridSpec(
            num_scalar_prefetch=0,
            grid=(N // nb,),
            in_specs=[
                pl.BlockSpec((nb, C, H, W), lambda n: (n, 0, 0, 0)),
                pl.BlockSpec((C, C), lambda n: (0, 0)),
                pl.BlockSpec((C, 1), lambda n: (0, 0)),
            ],
            out_specs=pl.BlockSpec((nb, C, H, W), lambda n: (n, 0, 0, 0)),
        ),
        compiler_params=pltpu.CompilerParams(
            dimension_semantics=("parallel",),
            vmem_limit_bytes=vmem),
        cost_estimate=cost,
    )(x, w, b2)


def crack_am(x, w, b, *, block_bytes=_TARGET_BLOCK_BYTES):
    """CrackAM forward.  x: (N, C, H, W); w: (C, C) 1x1-conv weight; b: (C,) bias."""
    N, C, H, W = x.shape
    w2 = w.reshape(C, C)       # accept (C, C) or (C, C, 1, 1)
    b2 = b.reshape(C, 1)
    itemsize = x.dtype.itemsize
    sample_bytes = C * _ceil_to(H, 8) * _ceil_to(W, 128) * itemsize
    # Fused single pass (minimal 2x HBM traffic) only when the NCHW layout is
    # already lane dense and a whole sample comfortably fits VMEM; otherwise two
    # lane-dense passes (H-tiled reduce + H*W-tiled scale).
    if W % 128 == 0 and sample_bytes <= 4 * block_bytes:
        return _crack_am_fused(x, w2, b2, block_bytes)
    gate = _crack_am_gate(x, w2, b2, block_bytes)                          # (N, C, 1) f32
    out_flat = _crack_am_scale(x.reshape(N, C, H * W), gate, block_bytes)  # lane-dense mul
    return out_flat.reshape(N, C, H, W)


def crack_am_ref(x, w, b):
    """Pure-JAX reference mirroring the PyTorch forward exactly."""
    max_h = jnp.max(x, axis=3)                       # (N, C, H)
    max_v = jnp.max(x, axis=2)                       # (N, C, W)
    xtmp = jnp.concatenate((max_h, max_v), axis=2)   # (N, C, H+W)
    pooled = jnp.mean(xtmp, axis=2)                  # (N, C)
    se = pooled @ w.reshape(w.shape[0], -1).T + b    # (N, C)  (1x1 conv)
    gate = jax.nn.sigmoid(se)[:, :, None, None]      # (N, C, 1, 1)
    return x * gate


if __name__ == "__main__":
    key = jax.random.PRNGKey(0)
    k_x, k_w, k_b, k_x2, k_x3 = jax.random.split(key, 5)

    # 1x1-conv parameters (Conv2d(C, C, 1)): weight (C, C), bias (C,)
    N, C = 2, 4
    w = 0.1 * jax.random.normal(k_w, (C, C), dtype=jnp.float32)
    b = 0.1 * jax.random.normal(k_b, (C,), dtype=jnp.float32)

    # Case 1: small spatial maps (W < 128) -> two-pass lane-dense path (single H tile).
    x = jax.random.normal(k_x, (N, C, 16, 16), dtype=jnp.float32)
    out = jax.block_until_ready(crack_am(x, w, b))
    ref = crack_am_ref(x, w, b)
    if not jnp.allclose(out, ref, atol=1e-5, rtol=1e-5):
        raise AssertionError("Pallas CrackAM (two-pass path) does not match reference")

    # Case 2: W % 128 == 0 and small sample -> fused single-pass path.
    x2 = jax.random.normal(k_x2, (N, C, 8, 128), dtype=jnp.float32)
    out2 = jax.block_until_ready(crack_am(x2, w, b))
    ref2 = crack_am_ref(x2, w, b)
    if not jnp.allclose(out2, ref2, atol=1e-5, rtol=1e-5):
        raise AssertionError("Pallas CrackAM (fused path) does not match reference")

    # Case 3: shrink the per-step block budget to exercise the "large sample"
    # path: H-tiled reduce (scratch accumulators) + H*W-tiled scale.
    x3 = jax.random.normal(k_x3, (N, C, 64, 128), dtype=jnp.float32)
    out3 = jax.block_until_ready(crack_am(x3, w, b, block_bytes=16 << 10))
    ref3 = crack_am_ref(x3, w, b)
    if not jnp.allclose(out3, ref3, atol=1e-5, rtol=1e-5):
        raise AssertionError("Pallas CrackAM (tiled path) does not match reference")

    print("KERNEL_OK")
</pallas_src>

<mosaic_0001>
module attributes {stable_mosaic.version = 11 : i64} {
  func.func @kernel(%arg0: i32, %arg1: i32, %arg2: memref<2x4x16x16xf32, #tpu.memory_space<vmem>>, %arg3: memref<4x4xf32, #tpu.memory_space<vmem>>, %arg4: memref<4x1xf32, #tpu.memory_space<vmem>>, %arg5: memref<2x4x1xf32, #tpu.memory_space<vmem>>, %arg6: memref<2x4x1xf32, #tpu.memory_space<vmem>>, %arg7: memref<2x4x16xf32, #tpu.memory_space<vmem>>) attributes {dimension_semantics = [#tpu.dimension_semantics<parallel>, #tpu.dimension_semantics<arbitrary>], iteration_bounds = array<i64: 1, 1>, scalar_prefetch = 0 : i64, scratch_operands = 2 : i64, tpu.core_type = #tpu.core_type<tc>, window_params = [{transform_indices = @transform_0, window_bounds = array<i64: 2, 4, 16, 16>}, {pipeline_mode = #tpu.pipeline_mode<synchronous>, transform_indices = @transform_1, window_bounds = array<i64: 4, 4>}, {pipeline_mode = #tpu.pipeline_mode<synchronous>, transform_indices = @transform_2, window_bounds = array<i64: 4, 1>}, {transform_indices = @transform_3, window_bounds = array<i64: 2, 4, 1>}]} {
    %c0_i32 = arith.constant 0 : i32
    %0 = arith.cmpi eq, %arg1, %c0_i32 : i32
    %1 = arith.extui %0 : i1 to i32
    %c0_i32_0 = arith.constant 0 : i32
    %2 = arith.cmpi ne, %1, %c0_i32_0 : i32
    scf.if %2 {
      %cst_38 = arith.constant 0.000000e+00 : f32
      %42 = vector.broadcast %cst_38 : f32 to vector<2x4x1xf32>
      %c0_39 = arith.constant 0 : index
      %c0_40 = arith.constant 0 : index
      %c0_41 = arith.constant 0 : index
      %43 = vector.load %arg6[%c0_39, %c0_40, %c0_41] : memref<2x4x1xf32, #tpu.memory_space<vmem>>, vector<2x4x1xf32>
      tpu.vector_store %arg6[%c0_39, %c0_40, %c0_41], %42 {strides = array<i32>} : memref<2x4x1xf32, #tpu.memory_space<vmem>>, vector<2x4x1xf32>,
      %cst_42 = arith.constant 0xFF800000 : f32
      %44 = vector.broadcast %cst_42 : f32 to vector<2x4x16xf32>
      %c0_43 = arith.constant 0 : index
      %c0_44 = arith.constant 0 : index
      %c0_45 = arith.constant 0 : index
      %45 = vector.load %arg7[%c0_43, %c0_44, %c0_45] : memref<2x4x16xf32, #tpu.memory_space<vmem>>, vector<2x4x16xf32>
      tpu.vector_store %arg7[%c0_43, %c0_44, %c0_45], %44 {strides = array<i32>} : memref<2x4x16xf32, #tpu.memory_space<vmem>>, vector<2x4x16xf32>,
    } else {
    }
    %c0 = arith.constant 0 : index
    %c0_1 = arith.constant 0 : index
    %c0_2 = arith.constant 0 : index
    %c0_3 = arith.constant 0 : index
    %3 = vector.load %arg2[%c0, %c0_1, %c0_2, %c0_3] : memref<2x4x16x16xf32, #tpu.memory_space<vmem>>, vector<1x4x16x16xf32>
    %4 = vector.shape_cast %3 : vector<1x4x16x16xf32> to vector<4x16x16xf32>
    %cst = arith.constant dense<0xFF800000> : vector<4x16xf32>
    %5 = vector.multi_reduction <maximumf>, %4, %cst [2] : vector<4x16x16xf32> to vector<4x16xf32>
    %cst_4 = arith.constant dense<0xFF800000> : vector<4x16xf32>
    %6 = vector.multi_reduction <maximumf>, %4, %cst_4 [1] : vector<4x16x16xf32> to vector<4x16xf32>
    %c0_5 = arith.constant 0 : index
    %c0_6 = arith.constant 0 : index
    %c0_7 = arith.constant 0 : index
    %7 = vector.load %arg6[%c0_5, %c0_6, %c0_7] : memref<2x4x1xf32, #tpu.memory_space<vmem>>, vector<1x4x1xf32>
    %8 = vector.shape_cast %7 : vector<1x4x1xf32> to vector<4x1xf32>
    %cst_8 = arith.constant dense<0.000000e+00> : vector<4xf32>
    %9 = vector.multi_reduction <add>, %5, %cst_8 [1] : vector<4x16xf32> to vector<4xf32>
    %10 = vector.shape_cast %9 : vector<4xf32> to vector<4x1xf32>
    %11 = arith.addf %8, %10 : vector<4x1xf32>
    %c0_9 = arith.constant 0 : index
    %c0_10 = arith.constant 0 : index
    %c0_11 = arith.constant 0 : index
    %12 = vector.load %arg6[%c0_9, %c0_10, %c0_11] : memref<2x4x1xf32, #tpu.memory_space<vmem>>, vector<1x4x1xf32>
    %13 = vector.shape_cast %12 : vector<1x4x1xf32> to vector<4x1xf32>
    %14 = vector.shape_cast %11 : vector<4x1xf32> to vector<1x4x1xf32>
    tpu.vector_store %arg6[%c0_9, %c0_10, %c0_11], %14 {strides = array<i32>} : memref<2x4x1xf32, #tpu.memory_space<vmem>>, vector<1x4x1xf32>,
    %c0_12 = arith.constant 0 : index
    %c0_13 = arith.constant 0 : index
    %c0_14 = arith.constant 0 : index
    %15 = vector.load %arg7[%c0_12, %c0_13, %c0_14] : memref<2x4x16xf32, #tpu.memory_space<vmem>>, vector<1x4x16xf32>
    %16 = vector.shape_cast %15 : vector<1x4x16xf32> to vector<4x16xf32>
    %17 = arith.maximumf %16, %6 : vector<4x16xf32>
    %c0_15 = arith.constant 0 : index
    %c0_16 = arith.constant 0 : index
    %c0_17 = arith.constant 0 : index
    %18 = vector.load %arg7[%c0_15, %c0_16, %c0_17] : memref<2x4x16xf32, #tpu.memory_space<vmem>>, vector<1x4x16xf32>
    %19 = vector.shape_cast %18 : vector<1x4x16xf32> to vector<4x16xf32>
    %20 = vector.shape_cast %17 : vector<4x16xf32> to vector<1x4x16xf32>
    tpu.vector_store %arg7[%c0_15, %c0_16, %c0_17], %20 {strides = array<i32>} : memref<2x4x16xf32, #tpu.memory_space<vmem>>, vector<1x4x16xf32>,
    %c1 = arith.constant 1 : index
    %c0_18 = arith.constant 0 : index
    %c0_19 = arith.constant 0 : index
    %c0_20 = arith.constant 0 : index
    %21 = vector.load %arg2[%c1, %c0_18, %c0_19, %c0_20] : memref<2x4x16x16xf32, #tpu.memory_space<vmem>>, vector<1x4x16x16xf32>
    %22 = vector.shape_cast %21 : vector<1x4x16x16xf32> to vector<4x16x16xf32>
    %cst_21 = arith.constant dense<0xFF800000> : vector<4x16xf32>
    %23 = vector.multi_reduction <maximumf>, %22, %cst_21 [2] : vector<4x16x16xf32> to vector<4x16xf32>
    %cst_22 = arith.constant dense<0xFF800000> : vector<4x16xf32>
    %24 = vector.multi_reduction <maximumf>, %22, %cst_22 [1] : vector<4x16x16xf32> to vector<4x16xf32>
    %c1_23 = arith.constant 1 : index
    %c0_24 = arith.constant 0 : index
    %c0_25 = arith.constant 0 : index
    %25 = vector.load %arg6[%c1_23, %c0_24, %c0_25] : memref<2x4x1xf32, #tpu.memory_space<vmem>>, vector<1x4x1xf32>
    %26 = vector.shape_cast %25 : vector<1x4x1xf32> to vector<4x1xf32>
    %cst_26 = arith.constant dense<0.000000e+00> : vector<4xf32>
    %27 = vector.multi_reduction <add>, %23, %cst_26 [1] : vector<4x16xf32> to vector<4xf32>
    %28 = vector.shape_cast %27 : vector<4xf32> to vector<4x1xf32>
    %29 = arith.addf %26, %28 : vector<4x1xf32>
    %c1_27 = arith.constant 1 : index
    %c0_28 = arith.constant 0 : index
    %c0_29 = arith.constant 0 : index
    %30 = vector.load %arg6[%c1_27, %c0_28, %c0_29] : memref<2x4x1xf32, #tpu.memory_space<vmem>>, vector<1x4x1xf32>
    %31 = vector.shape_cast %30 : vector<1x4x1xf32> to vector<4x1xf32>
    %32 = vector.shape_cast %29 : vector<4x1xf32> to vector<1x4x1xf32>
    tpu.vector_store %arg6[%c1_27, %c0_28, %c0_29], %32 {strides = array<i32>} : memref<2x4x1xf32, #tpu.memory_space<vmem>>, vector<1x4x1xf32>,
    %c1_30 = arith.constant 1 : index
    %c0_31 = arith.constant 0 : index
    %c0_32 = arith.constant 0 : index
    %33 = vector.load %arg7[%c1_30, %c0_31, %c0_32] : memref<2x4x16xf32, #tpu.memory_space<vmem>>, vector<1x4x16xf32>
    %34 = vector.shape_cast %33 : vector<1x4x16xf32> to vector<4x16xf32>
    %35 = arith.maximumf %34, %24 : vector<4x16xf32>
    %c1_33 = arith.constant 1 : index
    %c0_34 = arith.constant 0 : index
    %c0_35 = arith.constant 0 : index
    %36 = vector.load %arg7[%c1_33, %c0_34, %c0_35] : memref<2x4x16xf32, #tpu.memory_space<vmem>>, vector<1x4x16xf32>
    %37 = vector.shape_cast %36 : vector<1x4x16xf32> to vector<4x16xf32>
    %38 = vector.shape_cast %35 : vector<4x16xf32> to vector<1x4x16xf32>
    tpu.vector_store %arg7[%c1_33, %c0_34, %c0_35], %38 {strides = array<i32>} : memref<2x4x16xf32, #tpu.memory_space<vmem>>, vector<1x4x16xf32>,
    %c0_i32_36 = arith.constant 0 : i32
    %39 = arith.cmpi eq, %arg1, %c0_i32_36 : i32
    %40 = arith.extui %39 : i1 to i32
    %c0_i32_37 = arith.constant 0 : i32
    %41 = arith.cmpi ne, %40, %c0_i32_37 : i32
    scf.if %41 {
      %c0_38 = arith.constant 0 : index
      %c0_39 = arith.constant 0 : index
      %42 = vector.load %arg3[%c0_38, %c0_39] : memref<4x4xf32, #tpu.memory_space<vmem>>, vector<4x4xf32>
      %c0_40 = arith.constant 0 : index
      %c0_41 = arith.constant 0 : index
      %43 = vector.load %arg4[%c0_40, %c0_41] : memref<4x1xf32, #tpu.memory_space<vmem>>, vector<4x1xf32>
      %c0_42 = arith.constant 0 : index
      %c0_43 = arith.constant 0 : index
      %c0_44 = arith.constant 0 : index
      %44 = vector.load %arg6[%c0_42, %c0_43, %c0_44] : memref<2x4x1xf32, #tpu.memory_space<vmem>>, vector<1x4x1xf32>
      %45 = vector.shape_cast %44 : vector<1x4x1xf32> to vector<4x1xf32>
      %c0_45 = arith.constant 0 : index
      %c0_46 = arith.constant 0 : index
      %c0_47 = arith.constant 0 : index
      %46 = vector.load %arg7[%c0_45, %c0_46, %c0_47] : memref<2x4x16xf32, #tpu.memory_space<vmem>>, vector<1x4x16xf32>
      %47 = vector.shape_cast %46 : vector<1x4x16xf32> to vector<4x16xf32>
      %cst_48 = arith.constant dense<0.000000e+00> : vector<4xf32>
      %48 = vector.multi_reduction <add>, %47, %cst_48 [1] : vector<4x16xf32> to vector<4xf32>
      %49 = vector.shape_cast %48 : vector<4xf32> to vector<4x1xf32>
      %50 = arith.addf %45, %49 : vector<4x1xf32>
      %cst_49 = arith.constant 3.125000e-02 : f32
      %51 = vector.broadcast %cst_49 : f32 to vector<4x1xf32>
      %52 = arith.mulf %50, %51 : vector<4x1xf32>
      %cst_50 = arith.constant dense<0.000000e+00> : vector<4x1xf32>
      %53 = tpu.matmul %42, %52, %cst_50 {dimension_numbers = #tpu.dot_dimension_numbers<[1], [0], [0], [1], [0, 0, 1, 1], [], []>} : vector<4x4xf32>, vector<4x1xf32>, vector<4x1xf32> -> vector<4x1xf32>
      %54 = arith.addf %53, %43 : vector<4x1xf32>
      %55 = arith.negf %54 : vector<4x1xf32>
      %56 = math.exp %55 : vector<4x1xf32>
      %cst_51 = arith.constant 1.000000e+00 : f32
      %57 = vector.broadcast %cst_51 : f32 to vector<4x1xf32>
      %58 = arith.addf %57, %56 : vector<4x1xf32>
      %59 = arith.divf %57, %58 : vector<4x1xf32>
      %c0_52 = arith.constant 0 : index
      %c0_53 = arith.constant 0 : index
      %c0_54 = arith.constant 0 : index
      %60 = vector.load %arg5[%c0_52, %c0_53, %c0_54] : memref<2x4x1xf32, #tpu.memory_space<vmem>>, vector<1x4x1xf32>
      %61 = vector.shape_cast %60 : vector<1x4x1xf32> to vector<4x1xf32>
      %62 = vector.shape_cast %59 : vector<4x1xf32> to vector<1x4x1xf32>
      tpu.vector_store %arg5[%c0_52, %c0_53, %c0_54], %62 {strides = array<i32>} : memref<2x4x1xf32, #tpu.memory_space<vmem>>, vector<1x4x1xf32>,
      %c1_55 = arith.constant 1 : index
      %c0_56 = arith.constant 0 : index
      %c0_57 = arith.constant 0 : index
      %63 = vector.load %arg6[%c1_55, %c0_56, %c0_57] : memref<2x4x1xf32, #tpu.memory_space<vmem>>, vector<1x4x1xf32>
      %64 = vector.shape_cast %63 : vector<1x4x1xf32> to vector<4x1xf32>
      %c1_58 = arith.constant 1 : index
      %c0_59 = arith.constant 0 : index
      %c0_60 = arith.constant 0 : index
      %65 = vector.load %arg7[%c1_58, %c0_59, %c0_60] : memref<2x4x16xf32, #tpu.memory_space<vmem>>, vector<1x4x16xf32>
      %66 = vector.shape_cast %65 : vector<1x4x16xf32> to vector<4x16xf32>
      %cst_61 = arith.constant dense<0.000000e+00> : vector<4xf32>
      %67 = vector.multi_reduction <add>, %66, %cst_61 [1] : vector<4x16xf32> to vector<4xf32>
      %68 = vector.shape_cast %67 : vector<4xf32> to vector<4x1xf32>
      %69 = arith.addf %64, %68 : vector<4x1xf32>
      %cst_62 = arith.constant 3.125000e-02 : f32
      %70 = vector.broadcast %cst_62 : f32 to vector<4x1xf32>
      %71 = arith.mulf %69, %70 : vector<4x1xf32>
      %cst_63 = arith.constant dense<0.000000e+00> : vector<4x1xf32>
      %72 = tpu.matmul %42, %71, %cst_63 {dimension_numbers = #tpu.dot_dimension_numbers<[1], [0], [0], [1], [0, 0, 1, 1], [], []>} : vector<4x4xf32>, vector<4x1xf32>, vector<4x1xf32> -> vector<4x1xf32>
      %73 = arith.addf %72, %43 : vector<4x1xf32>
      %74 = arith.negf %73 : vector<4x1xf32>
      %75 = math.exp %74 : vector<4x1xf32>
      %cst_64 = arith.constant 1.000000e+00 : f32
      %76 = vector.broadcast %cst_64 : f32 to vector<4x1xf32>
      %77 = arith.addf %76, %75 : vector<4x1xf32>
      %78 = arith.divf %76, %77 : vector<4x1xf32>
      %c1_65 = arith.constant 1 : index
      %c0_66 = arith.constant 0 : index
      %c0_67 = arith.constant 0 : index
      %79 = vector.load %arg5[%c1_65, %c0_66, %c0_67] : memref<2x4x1xf32, #tpu.memory_space<vmem>>, vector<1x4x1xf32>
      %80 = vector.shape_cast %79 : vector<1x4x1xf32> to vector<4x1xf32>
      %81 = vector.shape_cast %78 : vector<4x1xf32> to vector<1x4x1xf32>
      tpu.vector_store %arg5[%c1_65, %c0_66, %c0_67], %81 {strides = array<i32>} : memref<2x4x1xf32, #tpu.memory_space<vmem>>, vector<1x4x1xf32>,
    } else {
    }
    return
  }
  func.func @transform_0(%arg0: i32, %arg1: i32) -> (i32, i32, i32, i32) {
    %c0_i32 = arith.constant 0 : i32
    %c0_i32_0 = arith.constant 0 : i32
    %c0_i32_1 = arith.constant 0 : i32
    return %arg0, %c0_i32, %arg1, %c0_i32_0 : i32, i32, i32, i32
  }
  func.func @transform_1(%arg0: i32, %arg1: i32) -> (i32, i32) {
    %c0_i32 = arith.constant 0 : i32
    %c0_i32_0 = arith.constant 0 : i32
    %c0_i32_1 = arith.constant 0 : i32
    return %c0_i32, %c0_i32_0 : i32, i32
  }
  func.func @transform_2(%arg0: i32, %arg1: i32) -> (i32, i32) {
    %c0_i32 = arith.constant 0 : i32
    %c0_i32_0 = arith.constant 0 : i32
    %c0_i32_1 = arith.constant 0 : i32
    return %c0_i32, %c0_i32_0 : i32, i32
  }
  func.func @transform_3(%arg0: i32, %arg1: i32) -> (i32, i32, i32) {
    %c0_i32 = arith.constant 0 : i32
    %c0_i32_0 = arith.constant 0 : i32
    %c0_i32_1 = arith.constant 0 : i32
    return %arg0, %c0_i32, %c0_i32_0 : i32, i32, i32
  }
}

</mosaic_0001>

<bundles_post_ra>
// kernel: tpu_custom_call.1
= control target key start
LH: loop header
LB: loop body
LE: loop exit
PB: predicated region body
PF: predicated region fallthrough
CT: control target
= control target key end

     0   :  { %8 = vsyncpa [#allocation5], 0  ;;  %s417_s15 = smov [#allocation4]   ;;  %s418_s17 = smov 128   ;;  %s510_s0 = inlined_call_operand.hbm [shape: f32[2,4,16,16], index: 0, kind: input, shape index: {}]   ;;  %s511_s1 = inlined_call_operand.vmem [shape: f32[4,4], index: 1, kind: input, shape index: {}]   ;;  %s512_s2 = inlined_call_operand.vmem [shape: f32[4,1], index: 2, kind: input, shape index: {}]   ;;  %s513_s3 = inlined_call_operand.vmem [shape: f32[2,4,1], index: 3, kind: output, shape index: {}]  }
   0x1   :  { %s13_s14 = sshll.u32 %s510_s0, 4  ;;  %s15_s16 = sshll.u32 %s417_s15, 4  ;;  %s14_s14 = int_to_ptr.hbm [resolvable:$true] %s13_s14  ;;  %s16_s16 = int_to_ptr.vmem [resolvable:$true] %s15_s16 }
   0x2   :  { %s419_s18 = smov 8  }
   0x3   :  { %21 = dma.hbm_to_vmem [thread:$0]  %s14_s14, 2048, %s16_s16, [#allocation5], %s418_s17, %s418_s17, %s419_s18  }
   0x4   :  { %415 = dma.done.wait [#allocation5], 2048  }
   0x5   :  { %416 = vsyncadd [#allocation5], 4294965248  ;;  %vm48_vm0 = vcmask 130048   ;;  %v152_v0 = vld [vmem:[#allocation4 + $0x40] sm:$0xff]  ;;  %v42_v1 = vld [vmem:[#allocation4 + $0x10] sm:$0xff]  ;;  %vm37_vm1 = vcmask 125952  }
   0x6   :  { %v40_v2 = vld [vmem:[#allocation4] sm:$0xff]  ;;  %v160_v3 = vsel %vm48_vm0, %v152_v0, -inf  ;;  %v55_v4 = vsel %vm48_vm0, %v42_v1, -inf  ;;  %v153_v6 = vld [vmem:[#allocation4 + $0x48] sm:$0xff]  ;;  %v43_v7 = vld [vmem:[#allocation4 + $0x18] sm:$0xff]  ;;  %vm126_vm2 = vcmask 1041409  }
   0x7   :  { %v49_v5 = vsel %vm48_vm0, %v40_v2, -inf  ;;  %v41_v8 = vld [vmem:[#allocation4 + $0x8] sm:$0xff]  ;;  %161 = vmax.xlane.f32.xlu2 %v160_v3  ;;  %56 = vmax.xlane.f32.xlu1 %v55_v4  ;;  %v163_v9 = vsel %vm48_vm0, %v153_v6, -inf  ;;  %v58_v10 = vsel %vm48_vm0, %v43_v7, -inf  ;;  %v155_v12 = vld [vmem:[#allocation4 + $0x58] sm:$0xff]  ;;  %v154_v13 = vld [vmem:[#allocation4 + $0x50] sm:$0xff] }
   0x8   :  { %v52_v11 = vsel %vm48_vm0, %v41_v8, -inf  ;;  %50 = vmax.xlane.f32.xlu0 %v49_v5  ;;  %v184_v14 = vmax.f32 %v160_v3, %v163_v9  ;;  %v80_v15 = vmax.f32 %v55_v4, %v58_v10  ;;  %v44_v17 = vld [vmem:[#allocation4 + $0x20] sm:$0xff]  ;;  %v157_v18 = vld [vmem:[#allocation4 + $0x68] sm:$0xff]  ;;  %v169_v20 = vsel %vm48_vm0, %v155_v12, -inf  ;;  %v47_v23 = vld [vmem:[#allocation4 + $0x38] sm:$0xff] }
   0x9   :  { %v73_v16 = vmax.f32 %v49_v5, %v52_v11  ;;  %v156_v19 = vld [vmem:[#allocation4 + $0x60] sm:$0xff]  ;;  %v166_v21 = vsel %vm48_vm0, %v154_v13, -inf  ;;  %v45_v22 = vld [vmem:[#allocation4 + $0x28] sm:$0xff]  ;;  %v46_v24 = vld [vmem:[#allocation4 + $0x30] sm:$0xff]  ;;  %v175_v26 = vsel %vm48_vm0, %v157_v18, -inf  ;;  %v61_v29 = vsel %vm48_vm0, %v44_v17, -inf }
   0xa   :  { %v191_v25 = vmax.f32 %v166_v21, %v169_v20  ;;  %v172_v27 = vsel %vm48_vm0, %v156_v19, -inf  ;;  %v64_v30 = vsel %vm48_vm0, %v45_v22, -inf  ;;  %v70_v31 = vsel %vm48_vm0, %v47_v23, -inf  ;;  %v158_v35 = vld [vmem:[#allocation4 + $0x70] sm:$0xff]  ;;  %v159_v36 = vld [vmem:[#allocation4 + $0x78] sm:$0xff] }
   0xb   :  { %v198_v28 = vmax.f32 %v172_v27, %v175_v26  ;;  %v67_v32 = vsel %vm48_vm0, %v46_v24, -inf  ;;  %v87_v33 = vmax.f32 %v61_v29, %v64_v30  ;;  %v178_v37 = vsel %vm48_vm0, %v158_v35, -inf }
   0xc   :  { %v94_v34 = vmax.f32 %v67_v32, %v70_v31  ;;  %v181_v38 = vsel %vm48_vm0, %v159_v36, -inf  ;;  %v81_v40 = vrot.slane %v80_v15, 4  ;;  %v74_v41 = vrot.slane %v73_v16, 4 }
   0xd   :  { %v205_v39 = vmax.f32 %v178_v37, %v181_v38  ;;  %v88_v42 = vrot.slane %v87_v33, 4  ;;  %v185_v44 = vrot.slane %v184_v14, 4  ;;  %v192_v45 = vrot.slane %v191_v25, 4 }
   0xe   :  { %v95_v43 = vrot.slane %v94_v34, 4  ;;  %v82_v46 = vmax.f32 %v80_v15, %v81_v40  ;;  %v75_v47 = vmax.f32 %v73_v16, %v74_v41  ;;  %v199_v48 = vrot.slane %v198_v28, 4 }
   0xf   :  { %164 = vmax.xlane.f32.xlu2 %v163_v9  ;;  %59 = vmax.xlane.f32.xlu1 %v58_v10  ;;  %v89_v49 = vmax.f32 %v87_v33, %v88_v42  ;;  %v206_v50 = vrot.slane %v205_v39, 4  ;;  %v186_v52 = vmax.f32 %v184_v14, %v185_v44  ;;  %v193_v53 = vmax.f32 %v191_v25, %v192_v45 }
  0x10   :  { %53 = vmax.xlane.f32.xlu0 %v52_v11  ;;  %v96_v51 = vmax.f32 %v94_v34, %v95_v43  ;;  %v83_v54 = vrot.slane %v82_v46, 2  ;;  %v76_v55 = vrot.slane %v75_v47, 2  ;;  %v200_v56 = vmax.f32 %v198_v28, %v199_v48 }
  0x11   :  { %v90_v57 = vrot.slane %v89_v49, 2  ;;  %v207_v58 = vmax.f32 %v205_v39, %v206_v50  ;;  %v187_v60 = vrot.slane %v186_v52, 2  ;;  %v194_v61 = vrot.slane %v193_v53, 2 }
  0x12   :  { %v97_v59 = vrot.slane %v96_v51, 2  ;;  %v84_v62 = vmax.f32 %v82_v46, %v83_v54  ;;  %v77_v63 = vmax.f32 %v75_v47, %v76_v55  ;;  %v201_v0 = vrot.slane %v200_v56, 2 }
  0x13   :  { %v91_v1 = vmax.f32 %v89_v49, %v90_v57  ;;  %v208_v2 = vrot.slane %v207_v58, 2  ;;  %v188_v4 = vmax.f32 %v186_v52, %v187_v60  ;;  %v195_v5 = vmax.f32 %v193_v53, %v194_v61 }
  0x14   :  { %v98_v3 = vmax.f32 %v96_v51, %v97_v59  ;;  %v85_v6 = vrot.slane %v84_v62, 1  ;;  %v78_v7 = vrot.slane %v77_v63, 1  ;;  %v202_v8 = vmax.f32 %v200_v56, %v201_v0 }
  0x15   :  { %v92_v9 = vrot.slane %v91_v1, 1  ;;  %v209_v10 = vmax.f32 %v207_v58, %v208_v2  ;;  %v189_v12 = vrot.slane %v188_v4, 1  ;;  %v196_v13 = vrot.slane %v195_v5, 1 }
  0x16   :  { %v99_v11 = vrot.slane %v98_v3, 1  ;;  %v420_v14 = vmov -inf   ;;  %v86_v15 = vmax.f32 %v84_v62, %v85_v6  ;;  %v79_v16 = vmax.f32 %v77_v63, %v78_v7 }
  0x17   :  { %62 = vmax.xlane.f32.xlu2 %v61_v29  ;;  %170 = vmax.xlane.f32.xlu1 %v169_v20  ;;  %38 = vst.msk [vmem:[#allocation3] sm:$0xf] %vm37_vm1, %v420_v14  ;;  %v203_v17 = vrot.slane %v202_v8, 1  ;;  %v93_v18 = vmax.f32 %v91_v1, %v92_v9  ;;  %v210_v19 = vrot.slane %v209_v10, 1  ;;  %v190_v24 = vmax.f32 %v188_v4, %v189_v12 }
  0x18   :  { %167 = vmax.xlane.f32.xlu0 %v166_v21  ;;  %39 = vst.msk [vmem:[#allocation3 + $0x4] sm:$0xf] %vm37_vm1, %v420_v14  ;;  %v100_v22 = vmax.f32 %v98_v3, %v99_v11  ;;  %v197_v25 = vmax.f32 %v195_v5, %v196_v13  ;;  %vm128_vm3 = vcmask 1042434   ;;  %vm130_vm4 = vcmask 1043459  }
  0x19   :  { %v211_v28 = vmax.f32 %v209_v10, %v210_v19  ;;  %vm34_vm5 = vcmask 3072   ;;  %v421_v44 = vmov 0.0   ;;  %v110_v46 = vlaneseq }
  0x1a   :  { %35 = vst.msk [vmem:[#allocation2] sm:$0xf] %vm34_vm5, %v421_v44  ;;  %vm115_vm6 = vcmask 130112   ;;  %vm271_vm7 = vcmask 1043456   ;;  %vm267_vm8 = vcmask 31744  }
  0x1b   :  { %36 = vst.msk [vmem:[#allocation2 + $0x4] sm:$0xf] %vm34_vm5, %v421_v44  ;;  %v111_v48 = vand.u32 127, %v110_v46 }
  0x1d   :  { %v113_v49 = vadd.s32 4294967288, %v111_v48 }
  0x1f   :  { %176 = vmax.xlane.f32.xlu2 %v175_v26  ;;  %173 = vmax.xlane.f32.xlu1 %v172_v27  ;;  %v204_v26 = vmax.f32 %v202_v8, %v203_v17  ;;  %v145_v27 = vsel %vm126_vm2, %v86_v15, %v79_v16  ;;  %v244_v35 = vld [vmem:[#allocation3 + $0x4] sm:$0xf] }
  0x20   :  { %65 = vmax.xlane.f32.xlu0 %v64_v30  ;;  %v146_v29 = vsel %vm128_vm3, %v93_v18, %v145_v27  ;;  %v140_v30 = vld [vmem:[#allocation3] sm:$0xf] }
  0x21   :  { %v101_v27 = vld [vmem:[#allocation2] sm:$0xf] }
  0x27   :  { %71 = vmax.xlane.f32.xlu1 %v70_v31  ;;  %179 = vmax.xlane.f32.xlu2 %v178_v37  ;;  %v147_v31 = vsel %vm130_vm4, %v100_v22, %v146_v29 }
  0x28   :  { %68 = vmax.xlane.f32.xlu0 %v67_v32  ;;  %v249_v32 = vsel %vm126_vm2, %v197_v25, %v190_v24  ;;  %v149_v33 = vmax.f32 %v140_v30, %v147_v31  ;;  %v213_v30 = vld [vmem:[#allocation2 + $0x4] sm:$0xf] }
  0x29   :  { %v250_v34 = vsel %vm128_vm3, %v204_v26, %v249_v32 }
  0x2a   :  { %v251_v37 = vsel %vm130_vm4, %v211_v28, %v250_v34  ;;  %150 = vst.msk [vmem:[#allocation3] sm:$0xf] %vm37_vm1, %v149_v33 }
  0x2b   :  { %v253_v40 = vmax.f32 %v244_v35, %v251_v37  ;;  %v258_v37 = vld [vmem:[%s511_s1] sm:$0xf] }
  0x2d   :  { %254 = vst.msk [vmem:[#allocation3 + $0x4] sm:$0xf] %vm37_vm1, %v253_v40 }
  0x30   :  { %182 = vmax.xlane.f32.xlu0 %v181_v38 }
  0x31   :  { %v261_v41 = vld [vmem:[#allocation3] sm:$0xf] }
  0x32   :  { %v262_v43 = vsel %vm37_vm1, %v261_v41, 0.0 }
  0x34   :  { %v316_v18 = vld [vmem:[#allocation3 + $0x4] sm:$0xf] }
  0x35   :  { %v317_v24 = vsel %vm37_vm1, %v316_v18, 0.0 }
  0x38   :  { %263 = vadd.xlane.f32.xlu0 %v262_v43 }
  0x7a   :  { %v463_v20 = vpop.xlane.xlu2 %161  ;;  %v57_v21 = vpop.xlane.xlu1 %56 }
  0x7b   :  { %v51_v23 = vpop.xlane.xlu0 %50  ;;  %v117_v52 = vperm.slane %v57_v21, %v111_v48  ;;  %v222_v11 = vperm.slane %v463_v20, %v111_v48 }
  0x7c   :  { %v112_v58 = vperm.slane %v51_v23, %v111_v48 }
  0x82   :  { %v60_v36 = vpop.xlane.xlu1 %59  ;;  %v165_v38 = vpop.xlane.xlu2 %164 }
  0x83   :  { %v54_v39 = vpop.xlane.xlu0 %53  ;;  %v118_v53 = vperm.slane %v60_v36, %v113_v49  ;;  %v223_v12 = vperm.slane %v165_v38, %v113_v49 }
  0x84   :  { %v114_v54 = vperm.slane %v54_v39, %v113_v49 }
  0x85   :  { %v119_v59 = vsel %vm115_vm6, %v118_v53, %v117_v52  ;;  %v224_v19 = vsel %vm115_vm6, %v223_v12, %v222_v11 }
  0x86   :  { %v116_v60 = vsel %vm115_vm6, %v114_v54, %v112_v58 }
  0x87   :  { %v127_v2 = vsel %vm126_vm2, %v119_v59, %v116_v60 }
  0x8a   :  { %v171_v42 = vpop.xlane.xlu1 %170  ;;  %v63_v47 = vpop.xlane.xlu2 %62 }
  0x8b   :  { %v168_v45 = vpop.xlane.xlu0 %167  ;;  %v120_v55 = vperm.slane %v63_v47, %v111_v48  ;;  %v226_v3 = vperm.slane %v171_v42, %v113_v49  ;;  %v259_v42 = vld [vmem:[%s512_s2] sm:$0xf] }
  0x8c   :  { %v225_v4 = vperm.slane %v168_v45, %v111_v48 }
  0x8e   :  { %v227_v14 = vsel %vm115_vm6, %v226_v3, %v225_v4 }
  0x8f   :  { %v234_v22 = vsel %vm126_vm2, %v227_v14, %v224_v19 }
  0x92   :  { %v174_v50 = vpop.xlane.xlu1 %173  ;;  %v177_v56 = vpop.xlane.xlu2 %176 }
  0x93   :  { %v66_v51 = vpop.xlane.xlu0 %65  ;;  %v229_v7 = vperm.slane %v177_v56, %v113_v49  ;;  %v228_v8 = vperm.slane %v174_v50, %v111_v48 }
  0x94   :  { %v121_v57 = vperm.slane %v66_v51, %v113_v49 }
  0x95   :  { %v230_v16 = vsel %vm115_vm6, %v229_v7, %v228_v8 }
  0x96   :  { %v122_v62 = vsel %vm115_vm6, %v121_v57, %v120_v55  ;;  %v235_v20 = vsel %vm128_vm3, %v230_v16, %v234_v22 }
  0x97   :  { %v129_v6 = vsel %vm128_vm3, %v122_v62, %v127_v2 }
  0x9a   :  { %v72_v61 = vpop.xlane.xlu1 %71  ;;  %v180_v10 = vpop.xlane.xlu2 %179 }
  0x9b   :  { %v124_v63 = vperm.slane %v72_v61, %v113_v49  ;;  %v69_v0 = vpop.xlane.xlu0 %68  ;;  %v231_v15 = vperm.slane %v180_v10, %v111_v48 }
  0x9c   :  { %v123_v1 = vperm.slane %v69_v0, %v111_v48 }
  0x9e   :  { %v125_v5 = vsel %vm115_vm6, %v124_v63, %v123_v1 }
  0x9f   :  { %v131_v9 = vsel %vm130_vm4, %v125_v5, %v129_v6 }
  0xa0   :  { %v134_v13 = vsel %vm37_vm1, %v131_v9, 0.0 }
  0xa1   :  { %135 = vadd.xlane.f32.xlu1 %v134_v13 }
  0xa3   :  { %v183_v17 = vpop.xlane.xlu0 %182 }
  0xa4   :  { %v232_v21 = vperm.slane %v183_v17, %v113_v49 }
  0xa6   :  { %v233_v23 = vsel %vm115_vm6, %v232_v21, %v231_v15 }
  0xa7   :  { %v236_v25 = vsel %vm130_vm4, %v233_v23, %v235_v20 }
  0xa8   :  { %v238_v26 = vsel %vm37_vm1, %v236_v25, 0.0 }
  0xa9   :  { %239 = vadd.xlane.f32.xlu2 %v238_v26  ;;  %318 = vadd.xlane.f32.xlu1 %v317_v24 }
  0xab   :  { %v264_v32 = vpop.xlane.xlu0 %263 }
 0x114   :  { %v136_v28 = vpop.xlane.xlu1 %135 }
 0x115   :  { %v137_v29 = vadd.f32 %v136_v28, %v101_v27 }
 0x117   :  { %139 = vst.msk [vmem:[#allocation2] sm:$0xf] %vm34_vm5, %v137_v29 }
 0x11c   :  { %v240_v31 = vpop.xlane.xlu2 %239  ;;  %v319_v38 = vpop.xlane.xlu1 %318 }
 0x11d   :  { %v241_v33 = vadd.f32 %v240_v31, %v213_v30 }
 0x11e   :  { %v260_v34 = vld [vmem:[#allocation2] sm:$0xf] }
 0x11f   :  { %242 = vst.msk [vmem:[#allocation2 + $0x4] sm:$0xf] %vm34_vm5, %v241_v33  ;;  %v265_v35 = vadd.f32 %v264_v32, %v260_v34 }
 0x121   :  { %v266_v36 = vmul.f32 0.03125, %v265_v35 }
 0x123   :  { %371 = vmatpush.msk.msra.mxu0 %vm271_vm7, %v266_v36 }
 0x124   :  { %372 = vmatmul.msk.f32.vlgmr.msra.gmra.mxu0 %vm267_vm8, %v258_v37 }
 0x126   :  { %v315_v39 = vld [vmem:[#allocation2 + $0x4] sm:$0xf] }
 0x127   :  { %v320_v40 = vadd.f32 %v319_v38, %v315_v39 }
 0x129   :  { %v321_v41 = vmul.f32 0.03125, %v320_v40 }
 0x12b   :  { %374 = vmatpush.msk.msra.mxu1 %vm271_vm7, %v321_v41 }
 0x12c   :  { %375 = vmatmul.msk.f32.vlgmr.msra.gmra.mxu1 %vm267_vm8, %v258_v37 }
 0x1a1   :  { %v292_v43 = vpop.f32.mrf.mxu0 }
 0x1a2   :  { %v293_v44 = vadd.f32 %v292_v43, %v259_v42 }
 0x1a4   :  { %v373_v45 = vmul.f32 -1.442695, %v293_v44 }
 0x1a6   :  { %383 = vpow2.f32 %v373_v45 }
 0x1a9   :  { %v342_v46 = vpop.f32.mrf.mxu1 }
 0x1aa   :  { %v343_v47 = vadd.f32 %v342_v46, %v259_v42 }
 0x1ac   :  { %v384_v48 = vpop.eup %383  ;;  %v376_v49 = vmul.f32 -1.442695, %v343_v47 }
 0x1ad   :  { %v298_v50 = vadd.f32 1.0, %v384_v48 }
 0x1ae   :  { %385 = vpow2.f32 %v376_v49 }
 0x1af   :  { %387 = vrcp.f32 %v298_v50  ;;  %v310_v56 = vand.u32 2147483648, %v298_v50  ;;  %vm304_vm9 = vweird.f32 %v298_v50  ;;  %v308_v58 = vand.u32 2147483647, %v298_v50 }
 0x1b1   :  { %v311_v61 = vor.u32 1.1754944e-38, %v310_v56  ;;  %vm309_vm12 = vcmp.eq.f32.partialorder %v308_v58, 8.507059e+37 }
 0x1b4   :  { %v386_v51 = vpop.eup %385 }
 0x1b5   :  { %v388_v52 = vpop.eup %387  ;;  %v348_v53 = vadd.f32 1.0, %v386_v51 }
 0x1b6   :  { %v300_v54 = vmul.f32 %v388_v52, %v298_v50  ;;  %vm305_vm10 = vweird.f32 %v388_v52 }
 0x1b7   :  { %389 = vrcp.f32 %v348_v53  ;;  %vm306_vm11 = vmor %vm304_vm9, %vm305_vm10  ;;  %v360_v2 = vand.u32 2147483648, %v348_v53  ;;  %v358_v4 = vand.u32 2147483647, %v348_v53  ;;  %vm354_vm14 = vweird.f32 %v348_v53 }
 0x1b8   :  { %v301_v55 = vsub.f32 1.0, %v300_v54 }
 0x1b9   :  { %v361_v6 = vor.u32 1.1754944e-38, %v360_v2  ;;  %vm359_vm0 = vcmp.eq.f32.partialorder %v358_v4, 8.507059e+37 }
 0x1ba   :  { %v302_v57 = vmul.f32 %v388_v52, %v301_v55 }
 0x1bc   :  { %v303_v59 = vadd.f32 %v388_v52, %v302_v57 }
 0x1bd   :  { %v390_v60 = vpop.eup %389 }
 0x1be   :  { %v307_v62 = vsel %vm306_vm11, %v388_v52, %v303_v59  ;;  %v350_v63 = vmul.f32 %v390_v60, %v348_v53  ;;  %vm355_vm13 = vweird.f32 %v390_v60 }
 0x1bf   :  { %v312_v0 = vsel %vm309_vm12, %v311_v61, %v307_v62  ;;  %vm356_vm15 = vmor %vm354_vm14, %vm355_vm13 }
 0x1c0   :  { %314 = vst.msk [vmem:[%s513_s3] sm:$0xf] %vm34_vm5, %v312_v0  ;;  %v351_v1 = vsub.f32 1.0, %v350_v63 }
 0x1c2   :  { %v352_v3 = vmul.f32 %v390_v60, %v351_v1 }
 0x1c4   :  { %v353_v5 = vadd.f32 %v390_v60, %v352_v3 }
 0x1c6   :  { %v357_v7 = vsel %vm356_vm15, %v390_v60, %v353_v5 }
 0x1c7   :  { %v362_v8 = vsel %vm359_vm0, %v361_v6, %v357_v7 }
 0x1c8   :  { %377 = vst.msk [vmem:[%s513_s3 + $0x4] sm:$0xf] %vm34_vm5, %v362_v8 }
 0x1c9   :  { %370 = vsyncpa [#allocation5], 1 }

</bundles_post_ra>
